<compile_context>
chip_gen: v7x
topology: tpu7x:2x2x1
jax: 0.10.0
libtpu: 0.0.40
codegen_flags: <defaults>
</compile_context>

<pallas_src>
import functools
import math

import jax
import jax.numpy as jnp
from jax.experimental import pallas as pl
from jax.experimental.pallas import tpu as pltpu


def _round_up(x, m):
    return (x + m - 1) // m * m


def _has_bf16_vector_units():
    """bf16 VPU/EUP exists on v6e and later; v2-v5 are f32-only vector math."""
    try:
        kind = jax.devices()[0].device_kind.lower()
    except Exception:
        return False
    return not any(tag in kind for tag in ("v2", "v3", "v4", "v5"))


# ---------------------------------------------------------------------------
# Stage 1: projection kernel.
#   Wh = X @ W                    (bf16 operands on MXU, f32 accumulate)
#   f  = Wh @ [a1 | a2 | 0...]    (lane-dense (Dp,128) bf16 RHS, one matmul,
#                                  single unmasked (tm,128) f32 store)
# ---------------------------------------------------------------------------
def _proj_kernel(x_ref, w_ref, a_ref, wh_ref, f_ref):
    wh = jnp.dot(x_ref[...], w_ref[...], preferred_element_type=jnp.float32)
    wh_bf16 = wh.astype(jnp.bfloat16)
    wh_ref[...] = wh_bf16
    f_ref[...] = jnp.dot(wh_bf16, a_ref[...], preferred_element_type=jnp.float32)


# ---------------------------------------------------------------------------
# Stage 2a: single-pass masked softmax + aggregation (+ ELU).
# Used when the whole column extent fits one tile (Nt <= ~2K).
# grid = (row tiles,).  f2 row, adjacency row-strip and Wh are all resident /
# streamed once; no online-softmax rescale work at all.
# ---------------------------------------------------------------------------
def _attn_single_kernel(alpha, concat, exp_bf16,
                        f1_ref, f2_ref, adj_ref, wh_ref, out_ref):
    # e = leaky_relu(f1_i + f2_j), masked where adj == 0 (int8 compare, no cast)
    e = f1_ref[...] + f2_ref[...]                       # (tm,1)+(1,Nt) -> (tm,Nt)
    e = jnp.where(e > 0, e, alpha * e)                  # LeakyReLU(alpha)
    e = jnp.where(adj_ref[...] > 0, e, -1000000.0)

    m = jnp.max(e, axis=1, keepdims=True)
    if exp_bf16:                                        # v6e/v7x: bf16 EUP/VPU
        p = jnp.exp((e - m).astype(jnp.bfloat16))
        l = jnp.sum(p.astype(jnp.float32), axis=1, keepdims=True)
        acc = jnp.dot(p, wh_ref[...], preferred_element_type=jnp.float32)
    else:                                               # v5e: keep f32 vector math
        p = jnp.exp(e - m)
        l = jnp.sum(p, axis=1, keepdims=True)
        acc = jnp.dot(p.astype(wh_ref.dtype), wh_ref[...],
                      preferred_element_type=jnp.float32)

    vals = acc * pl.reciprocal(l, approx=True)
    if concat:                                          # static Python branch
        vals = jnp.where(vals > 0, vals, jnp.expm1(vals))   # ELU
    out_ref[...] = vals.astype(out_ref.dtype)


# ---------------------------------------------------------------------------
# Stage 2b: flash-style online-softmax kernel for large graphs.
# grid = (row tiles, column tiles); running (m, l, acc) live in VMEM scratch.
# Wh is VMEM-resident (constant-index BlockSpec) when it fits, else streamed.
# ---------------------------------------------------------------------------
def _attn_flash_kernel(alpha, concat, exp_bf16, tk, wh_resident,
                       f1_ref, f2_ref, adj_ref, wh_ref, out_ref,
                       m_sc, l_sc, acc_sc):
    j = pl.program_id(1)

    @pl.when(j == 0)
    def _():
        m_sc[...] = jnp.full_like(m_sc, -jnp.inf)
        l_sc[...] = jnp.zeros_like(l_sc)
        acc_sc[...] = jnp.zeros_like(acc_sc)

    e = f1_ref[...] + f2_ref[...]                       # (tm,1)+(1,tk) -> (tm,tk)
    e = jnp.where(e > 0, e, alpha * e)
    e = jnp.where(adj_ref[...] > 0, e, -1000000.0)      # int8 compare, no cast

    if wh_resident:
        col0 = pl.multiple_of(j * tk, tk)
        wh_tile = wh_ref[pl.ds(col0, tk), :]            # slice of resident Wh
    else:
        wh_tile = wh_ref[...]

    # Online softmax update.
    m_prev = m_sc[...]
    m_new = jnp.maximum(m_prev, jnp.max(e, axis=1, keepdims=True))
    corr = jnp.exp(m_prev - m_new)
    if exp_bf16:
        p = jnp.exp((e - m_new).astype(jnp.bfloat16))
        row_sum = jnp.sum(p.astype(jnp.float32), axis=1, keepdims=True)
        pv = jnp.dot(p, wh_tile, preferred_element_type=jnp.float32)
    else:
        p = jnp.exp(e - m_new)
        row_sum = jnp.sum(p, axis=1, keepdims=True)
        pv = jnp.dot(p.astype(wh_tile.dtype), wh_tile,
                     preferred_element_type=jnp.float32)
    l_sc[...] = corr * l_sc[...] + row_sum
    acc_sc[...] = corr * acc_sc[...] + pv
    m_sc[...] = m_new

    @pl.when(j == pl.num_programs(1) - 1)
    def _():
        vals = acc_sc[...] * pl.reciprocal(l_sc[...], approx=True)
        if concat:
            vals = jnp.where(vals > 0, vals, jnp.expm1(vals))
        out_ref[...] = vals.astype(out_ref.dtype)


def gat_layer(features, adj, W, a, *, alpha=0.2, concat=True,
              tm=128, tk=256, force_flash=False,
              max_single_pass_cols=2048, exp_bf16=None):
    """features: (N, F_in) f32, adj: (N, N) f32, W: (F_in, D), a: (2D, 1)."""
    N, F_in = features.shape
    D = W.shape[1]
    Dp = _round_up(D, 128)                    # lane-dense Wh / output

    if exp_bf16 is None:
        exp_bf16 = _has_bf16_vector_units()

    single_pass = (not force_flash) and _round_up(N, tm) <= max_single_pass_cols
    if single_pass:
        Nt = _round_up(N, math.lcm(tm, 128))
    else:
        Nt = _round_up(N, math.lcm(tm, tk))
    nr = Nt // tm                             # tm=128 keeps nr>=2 for N>128 (v7x TCs)

    # --- wrapper-side padding / casts (tiny XLA ops) ---
    # TODO(synk): for multi-head / multi-layer reuse, bit-pack the mask to
    #             1 bit/edge and unpack in-kernel (8x less mask HBM traffic).
    x = jnp.zeros((Nt, F_in), jnp.bfloat16).at[:N, :].set(
        features.astype(jnp.bfloat16))
    w = jnp.zeros((F_in, Dp), jnp.bfloat16).at[:, :D].set(W.astype(jnp.bfloat16))
    a_pad = jnp.zeros((Dp, 128), jnp.bfloat16)
    a_pad = a_pad.at[:D, 0].set(a[:D, 0].astype(jnp.bfloat16))
    a_pad = a_pad.at[:D, 1].set(a[D:, 0].astype(jnp.bfloat16))
    adj_i8 = jnp.zeros((Nt, Nt), jnp.int8).at[:N, :N].set(
        (adj > 0).astype(jnp.int8))

    # --- stage 1: Wh (bf16) + fused attention projections f = [f1 | f2 | 0..] ---
    wh, f = pl.pallas_call(
        _proj_kernel,
        out_shape=(jax.ShapeDtypeStruct((Nt, Dp), jnp.bfloat16),
                   jax.ShapeDtypeStruct((Nt, 128), jnp.float32)),
        grid=(nr,),
        in_specs=[pl.BlockSpec((tm, F_in), lambda i: (i, 0)),
                  pl.BlockSpec((F_in, Dp), lambda i: (0, 0)),
                  pl.BlockSpec((Dp, 128), lambda i: (0, 0))],
        out_specs=(pl.BlockSpec((tm, Dp), lambda i: (i, 0)),
                   pl.BlockSpec((tm, 128), lambda i: (i, 0))),
        compiler_params=pltpu.CompilerParams(
            dimension_semantics=("parallel",)),
    )(x, w, a_pad)

    # Hoist the f2 transpose out of the tiled loop (pre-pass, lane orientation).
    f1 = f[:, 0:1]                   # (Nt, 1)
    f2t = f[:, 1:2].reshape(1, Nt)   # (1, Nt)  (trivial row-major reshape)

    if single_pass:
        # --- stage 2a: single-pass softmax; Wh, f2 and the adjacency row-strip
        #     are loaded once per row tile, no online-softmax machinery. ---
        out_p = pl.pallas_call(
            functools.partial(_attn_single_kernel, alpha, concat, exp_bf16),
            out_shape=jax.ShapeDtypeStruct((Nt, Dp), jnp.float32),
            grid=(nr,),
            in_specs=[pl.BlockSpec((tm, 1), lambda i: (i, 0)),
                      pl.BlockSpec((1, Nt), lambda i: (0, 0)),      # resident
                      pl.BlockSpec((tm, Nt), lambda i: (i, 0)),
                      pl.BlockSpec((Nt, Dp), lambda i: (0, 0))],    # resident Wh
            out_specs=pl.BlockSpec((tm, Dp), lambda i: (i, 0)),
            compiler_params=pltpu.CompilerParams(
                dimension_semantics=("parallel",),
                vmem_limit_bytes=48 * 1024 * 1024),
        )(f1, f2t, adj_i8, wh)
    else:
        # --- stage 2b: tiled flash-style attention for large graphs ---
        nc = Nt // tk
        wh_resident = Nt * Dp * 2 <= 8 * 1024 * 1024    # bf16 bytes, incl 2x buf OK
        wh_spec = (pl.BlockSpec((Nt, Dp), lambda i, j: (0, 0)) if wh_resident
                   else pl.BlockSpec((tk, Dp), lambda i, j: (j, 0)))
        out_p = pl.pallas_call(
            functools.partial(_attn_flash_kernel, alpha, concat, exp_bf16, tk,
                              wh_resident),
            out_shape=jax.ShapeDtypeStruct((Nt, Dp), jnp.float32),
            grid=(nr, nc),
            in_specs=[pl.BlockSpec((tm, 1), lambda i, j: (i, 0)),
                      pl.BlockSpec((1, tk), lambda i, j: (0, j)),
                      pl.BlockSpec((tm, tk), lambda i, j: (i, j)),
                      wh_spec],
            out_specs=pl.BlockSpec((tm, Dp), lambda i, j: (i, 0)),
            scratch_shapes=[pltpu.VMEM((tm, 1), jnp.float32),
                            pltpu.VMEM((tm, 1), jnp.float32),
                            pltpu.VMEM((tm, Dp), jnp.float32)],
            compiler_params=pltpu.CompilerParams(
                dimension_semantics=("parallel", "arbitrary"),
                vmem_limit_bytes=48 * 1024 * 1024),
        )(f1, f2t, adj_i8, wh)

    return out_p[:N, :D]


def _xavier_uniform(key, shape, gain):
    fan_in, fan_out = shape[0], shape[1]
    bound = gain * jnp.sqrt(6.0 / (fan_in + fan_out))
    return jax.random.uniform(key, shape, jnp.float32, -bound, bound)


def gat_reference(features, adj, W, a, alpha):
    """Pure-JAX f32 reference mirroring the PyTorch forward (eval mode)."""
    Wh = features @ W
    D = W.shape[1]
    e = Wh @ a[:D, :] + (Wh @ a[D:, :]).T
    e = jnp.where(e > 0, e, alpha * e)
    att = jnp.where(adj > 0, e, -1000000.0 * jnp.ones_like(e))
    att = jax.nn.softmax(att, axis=1)
    vals = att @ Wh
    return jnp.where(vals > 0, vals, jnp.expm1(vals))


if __name__ == "__main__":
    # Deterministic setup; N chosen non-multiple of the tile so padding is
    # exercised.  Both stage-2 paths (single-pass and flash) are validated.
    N, in_dim, out_dim = 300, 48, 32
    alpha = 0.2
    gain = 1.414

    key = jax.random.PRNGKey(0)
    k_feat, k_adj, k_w, k_a = jax.random.split(key, 4)

    features = jax.random.normal(k_feat, (N, in_dim), jnp.float32)
    # Random sparse-ish adjacency with self loops.
    adj = (jax.random.uniform(k_adj, (N, N)) > 0.6).astype(jnp.float32)
    adj = jnp.maximum(adj, jnp.eye(N, dtype=jnp.float32))

    W = _xavier_uniform(k_w, (in_dim, out_dim), gain)
    a = _xavier_uniform(k_a, (2 * out_dim, 1), gain)

    ref = gat_reference(features, adj, W, a, alpha)

    # Path 1: single-pass softmax (default for small/medium graphs).
    out = gat_layer(features, adj, W, a, alpha=alpha)
    out = jax.block_until_ready(out)
    assert out.shape == (N, out_dim)
    # Tolerance reflects intentional bf16 MXU operands + approx reciprocal.
    assert jnp.allclose(out, ref, atol=1e-1, rtol=1e-1), "single-pass mismatch"

    # Path 2: flash-style online-softmax (forced, validates the large-N path).
    out_flash = gat_layer(features, adj, W, a, alpha=alpha, force_flash=True)
    out_flash = jax.block_until_ready(out_flash)
    assert out_flash.shape == (N, out_dim)
    assert jnp.allclose(out_flash, ref, atol=1e-1, rtol=1e-1), "flash mismatch"

    print("KERNEL_OK")
</pallas_src>

<mosaic_0001>
module attributes {stable_mosaic.version = 11 : i64} {
  func.func @_proj_kernel(%arg0: i32, %arg1: memref<128x48xbf16, #tpu.memory_space<vmem>>, %arg2: memref<48x128xbf16, #tpu.memory_space<vmem>>, %arg3: memref<128x128xbf16, #tpu.memory_space<vmem>>, %arg4: memref<128x128xbf16, #tpu.memory_space<vmem>>, %arg5: memref<128x128xf32, #tpu.memory_space<vmem>>) attributes {dimension_semantics = [#tpu.dimension_semantics<parallel>], iteration_bounds = array<i64: 3>, scalar_prefetch = 0 : i64, scratch_operands = 0 : i64, tpu.core_type = #tpu.core_type<tc>, window_params = [{transform_indices = @transform_0, window_bounds = array<i64: 128, 48>}, {pipeline_mode = #tpu.pipeline_mode<synchronous>, transform_indices = @transform_1, window_bounds = array<i64: 48, 128>}, {pipeline_mode = #tpu.pipeline_mode<synchronous>, transform_indices = @transform_2, window_bounds = array<i64: 128, 128>}, {transform_indices = @transform_3, window_bounds = array<i64: 128, 128>}, {transform_indices = @transform_4, window_bounds = array<i64: 128, 128>}]} {
    %c0 = arith.constant 0 : index
    %c0_0 = arith.constant 0 : index
    %0 = vector.load %arg1[%c0, %c0_0] : memref<128x48xbf16, #tpu.memory_space<vmem>>, vector<128x48xbf16>
    %c0_1 = arith.constant 0 : index
    %c0_2 = arith.constant 0 : index
    %1 = vector.load %arg2[%c0_1, %c0_2] : memref<48x128xbf16, #tpu.memory_space<vmem>>, vector<48x128xbf16>
    %cst = arith.constant dense<0.000000e+00> : vector<128x128xf32>
    %2 = tpu.matmul %0, %1, %cst {dimension_numbers = #tpu.dot_dimension_numbers<[1], [0], [0], [1], [0, 0, 1, 1], [], []>} : vector<128x48xbf16>, vector<48x128xbf16>, vector<128x128xf32> -> vector<128x128xf32>
    %3 = arith.truncf %2 : vector<128x128xf32> to vector<128x128xbf16>
    %c0_3 = arith.constant 0 : index
    %c0_4 = arith.constant 0 : index
    %4 = vector.load %arg4[%c0_3, %c0_4] : memref<128x128xbf16, #tpu.memory_space<vmem>>, vector<128x128xbf16>
    tpu.vector_store %arg4[%c0_3, %c0_4], %3 {strides = array<i32>} : memref<128x128xbf16, #tpu.memory_space<vmem>>, vector<128x128xbf16>,
    %c0_5 = arith.constant 0 : index
    %c0_6 = arith.constant 0 : index
    %5 = vector.load %arg3[%c0_5, %c0_6] : memref<128x128xbf16, #tpu.memory_space<vmem>>, vector<128x128xbf16>
    %cst_7 = arith.constant dense<0.000000e+00> : vector<128x128xf32>
    %6 = tpu.matmul %3, %5, %cst_7 {dimension_numbers = #tpu.dot_dimension_numbers<[1], [0], [0], [1], [0, 0, 1, 1], [], []>} : vector<128x128xbf16>, vector<128x128xbf16>, vector<128x128xf32> -> vector<128x128xf32>
    %c0_8 = arith.constant 0 : index
    %c0_9 = arith.constant 0 : index
    %7 = vector.load %arg5[%c0_8, %c0_9] : memref<128x128xf32, #tpu.memory_space<vmem>>, vector<128x128xf32>
    tpu.vector_store %arg5[%c0_8, %c0_9], %6 {strides = array<i32>} : memref<128x128xf32, #tpu.memory_space<vmem>>, vector<128x128xf32>,
    return
  }
  func.func @transform_0(%arg0: i32) -> (i32, i32) {
    %c0_i32 = arith.constant 0 : i32
    %c0_i32_0 = arith.constant 0 : i32
    return %arg0, %c0_i32 : i32, i32
  }
  func.func @transform_1(%arg0: i32) -> (i32, i32) {
    %c0_i32 = arith.constant 0 : i32
    %c0_i32_0 = arith.constant 0 : i32
    %c0_i32_1 = arith.constant 0 : i32
    return %c0_i32, %c0_i32_0 : i32, i32
  }
  func.func @transform_2(%arg0: i32) -> (i32, i32) {
    %c0_i32 = arith.constant 0 : i32
    %c0_i32_0 = arith.constant 0 : i32
    %c0_i32_1 = arith.constant 0 : i32
    return %c0_i32, %c0_i32_0 : i32, i32
  }
  func.func @transform_3(%arg0: i32) -> (i32, i32) {
    %c0_i32 = arith.constant 0 : i32
    %c0_i32_0 = arith.constant 0 : i32
    return %arg0, %c0_i32 : i32, i32
  }
  func.func @transform_4(%arg0: i32) -> (i32, i32) {
    %c0_i32 = arith.constant 0 : i32
    %c0_i32_0 = arith.constant 0 : i32
    return %arg0, %c0_i32 : i32, i32
  }
}

</mosaic_0001>

<bundles_post_ra>
// kernel: tpu_custom_call.1
= control target key start
LH: loop header
LB: loop body
LE: loop exit
PB: predicated region body
PF: predicated region fallthrough
CT: control target
= control target key end

     0   :  { %10 = vsyncpa [#allocation3], 0  ;;  %s1434_s0 = inlined_call_operand.vmem [shape: bf16[384,48], index: 0, kind: input, shape index: {}]   ;;  %s1435_s1 = inlined_call_operand.vmem [shape: bf16[48,128], index: 1, kind: input, shape index: {}]   ;;  %s1436_s2 = inlined_call_operand.vmem [shape: bf16[128,128], index: 2, kind: input, shape index: {}]   ;;  %s1437_s3 = inlined_call_operand.hbm [shape: bf16[384,128], index: 3, kind: output, shape index: {0}]   ;;  %s1438_s4 = inlined_call_operand.hbm [shape: f32[384,128], index: 4, kind: output, shape index: {1}]  }
   0x1   :  { %12 = vsyncpa [#allocation3 + $0x1], 0 }
   0x2   :  { %13 = vsyncpa [#allocation5], 0 }
   0x3   :  { %15 = vsyncpa [#allocation5 + $0x1], 0  ;;  %s1215_s15 = smov 0   ;;  %s1217_s16 = smov 0  }
   0x4   :  { %s1219_s17 = smov 0   ;;  %s1221_s18 = smov 0  }
   0x5 LB: > { %s1236_s19 = sadd.s32 4294967295, %s1182_s18   ;;  %s800_s20 = sadd.s32 4294967294, %s1182_s18   ;;  %s1182_s18 = sphi %s1221_s18, %s1444_s18   ;;  %s1178_s17 = sphi %s1219_s17, %s1443_s17   ;;  %s1174_s16 = sphi %s1217_s16, %s1442_s16   ;;  %s1170_s15 = sphi %s1215_s15, %s1441_s15  }
   0x6   : > { %s1240_s21 = sadd.s32 1, %s1182_s18   ;;  %s96_s22 = sadd.s32 1, %s1178_s17 }
   0x7   : > { %s93_s23 = ssub.s32 %s1182_s18, %s1240_s21  ;;  %p106_p0 = scmp.ne.s32.totalorder %s1178_s17, %s1174_s16 }
   0x8   : > { %p94_p1 = scmp.eq.s32.totalorder %s93_s23, 0  ;;  %p107_p2 = scmp.eq.s32.totalorder %s1236_s19, 2 }
   0x9   : > { %p112_p3 = scmp.ne.s32.totalorder %s1174_s16, %s1170_s15  ;;  %p113_p4 = scmp.eq.s32.totalorder %s800_s20, 2 }
   0xa   : > { %s1251_s24 = scalar_select %p94_p1, %s1178_s17, %s96_s22  }
   0xb   : > { %p1253_p5 = por %p107_p2, %p106_p0  ;;  %p1257_p6 = por %p113_p4, %p112_p3 }
   0xc   : > { %p803_p7 = scmp.ge.s32.totalorder %s1182_s18, 1  ;;  %p172_p8 = scmp.lt.s32.totalorder %s1182_s18, 4 }
   0xe   : > { %p173_p9 = pnand %p803_p7, %p172_p8 }
   0xf   : > { %v1069_v0 = vld [vmem:[%s1435_s1] sm:$0xff] (!%p173_p9)   ;;  %s806_s29 = sshll.u32 (!%p173_p9), %s1236_s19, 4  ;;  %v1070_v1 = vld [vmem:[%s1435_s1 + $0x8] sm:$0xff] (!%p173_p9)   ;;  %v1071_v3 = vld [vmem:[%s1435_s1 + $0x10] sm:$0xff] (!%p173_p9)   ;;  %vm292_vm0 = vcmask (!%p173_p9), 392192   ;;  %s1319_s11 = sand.u32 (!%p173_p9), 1, %s1174_s16  }
  0x10   : > { %176 = sbr.rel (%p173_p9) target bundleno = 500 (0x1f4), region = 32  ;;  %p204_p10 = scmp.lt.s32.totalorder (!%p173_p9), %s806_s29, 47  ;;  %951 = vmatprep.subr.bf16.mxu0 (!%p173_p9), %v1069_v0  ;;  %v1080_v2 = vld [vmem:[%s1436_s2] sm:$0xff] (!%p173_p9)   ;;  %v1081_v4 = vld [vmem:[%s1436_s2 + $0x8] sm:$0xff] (!%p173_p9)   ;;  %v1082_v6 = vld [vmem:[%s1436_s2 + $0x10] sm:$0xff] (!%p173_p9)  }
  0x11   : > { %952 = vmatpush3.bf16.msra.mxu0 (!%p173_p9), %v1069_v0  ;;  %1005 = vmatprep.subr.bf16.mxu1 (!%p173_p9), %v1080_v2  ;;  %v1083_v9 = vld [vmem:[%s1436_s2 + $0x18] sm:$0xff] (!%p173_p9)   ;;  %v1084_v10 = vld [vmem:[%s1436_s2 + $0x20] sm:$0xff] (!%p173_p9)   ;;  %v1085_v13 = vld [vmem:[%s1436_s2 + $0x28] sm:$0xff] (!%p173_p9)   ;;  %s804_s12 = sshll.u32 (!%p173_p9), %s1319_s11, 6  ;;  %s875_s14 = sshll.u32 (!%p173_p9), %s1236_s19, 10 }
  0x12   : > { %953 = vmatprep.subr.bf16.mxu0 (!%p173_p9), %v1070_v1  ;;  %1013 = vmatpush3.bf16.msra.mxu1 (!%p173_p9), %v1080_v2  ;;  %v1086_v14 = vld [vmem:[%s1436_s2 + $0x30] sm:$0xff] (!%p173_p9)   ;;  %v1087_v18 = vld [vmem:[%s1436_s2 + $0x38] sm:$0xff] (!%p173_p9)   ;;  %s1322_s13 = scalar_lea.vmem (!%p173_p9), [#allocation2], %s804_s12  ;;  %s1337_s27 = scalar_lea.hbm (!%p173_p9), %s1437_s3, %s875_s14 }
  0x13   : > { %1006 = vmatprep.subr.bf16.mxu1 (!%p173_p9), %v1081_v4  ;;  %s672_s28 = scalar_lea.sflag (!%p173_p9), [#allocation3], %s1319_s11  ;;  %s1184_s30 = smov (!%p173_p9), [#allocation2]  }
  0x14   : > { %s1092_s5 = sshll.u32 (!%p173_p9), %s1184_s30, 4  ;;  %s1093_s5 = int_to_ptr.vmem [resolvable:$false] %s1092_s5 }
  0x15   : > { %954 = vmatpush3.bf16.msra.mxu0 (!%p173_p9), %v1070_v1  ;;  %s1094_s6 = scalar_lea.vmem (!%p173_p9), %s1093_s5, 2048 }
  0x16   : > { %955 = vmatprep.subr.bf16.mxu0 (!%p173_p9), %v1071_v3  ;;  %1014 = vmatpush3.bf16.msra.mxu1 (!%p173_p9), %v1081_v4 }
  0x17   : > { %s1446_s29 = smov (!%p204_p10, %s806_s29), 47  ;;  %1007 = vmatprep.subr.bf16.mxu1 %v1082_v6 }
  0x18   : > { %s807_s10 = sshll.u32 %s1446_s29, 2 }
  0x19   : > { %s1282_s20 = scalar_lea.vmem %s1434_s0, %s807_s10  ;;  %956 = vmatpush3.bf16.msra.mxu0 %v1071_v3 }
  0x1a   : > { %v1072_v5 = vld [vmem:[%s1282_s20] sm:$0xff]   ;;  %v1073_v7 = vld [vmem:[%s1282_s20 + $0x8] sm:$0xff]   ;;  %v1074_v8 = vld [vmem:[%s1282_s20 + $0x10] sm:$0xff]   ;;  %973 = vmatprep.subr.bf16.mxu0 %v1080_v2  ;;  %1015 = vmatpush3.bf16.msra.mxu1 %v1082_v6 }
  0x1b   : > { %957 = vmatprep.mubr.msk.bf16.mxu0 %vm292_vm0, %v1072_v5  ;;  %1008 = vmatprep.subr.bf16.mxu1 %v1083_v9  ;;  %v1075_v11 = vld [vmem:[%s1282_s20 + $0x18] sm:$0xff]   ;;  %v1076_v12 = vld [vmem:[%s1282_s20 + $0x20] sm:$0xff]   ;;  %v1077_v15 = vld [vmem:[%s1282_s20 + $0x28] sm:$0xff]  }
  0x1c   : > { %958 = vmatmul.mubr.msk.bf16.vlgmr.msra.gmra.mrb[0].mxu0 %vm292_vm0, %v1073_v7  ;;  %v1078_v16 = vld [vmem:[%s1282_s20 + $0x30] sm:$0xff]   ;;  %v1079_v17 = vld [vmem:[%s1282_s20 + $0x38] sm:$0xff]   ;;  %s690_s20 = sshll.u32 %s1322_s13, 4  ;;  %s1339_s20 = int_to_ptr.vmem [resolvable:$true] %s690_s20 }
  0x1d   : > { %961 = vmatprep.mubr.msk.bf16.mxu0 %vm292_vm0, %v1074_v8  ;;  %974 = vmatpush3.bf16.msra.mxu0 %v1080_v2  ;;  %s1088_s29 = scalar_lea.vmem %s1339_s20, 1024  ;;  %p1095_p0 = scmp.lt.s32.totalorder %s1339_s20, %s1093_s5 }
  0x1e   : > { %975 = vmatprep.subr.bf16.mxu0 %v1081_v4  ;;  %1016 = vmatpush3.bf16.msra.mxu1 %v1083_v9  ;;  %p1089_p11 = scmp.ne.s32.totalorder %s1339_s20, %s1088_s29  ;;  %p1096_p1 = scmp.lt.s32.totalorder %s1094_s6, %s1088_s29 }
  0x1f   : > { %1009 = vmatprep.subr.bf16.mxu1 %v1084_v10 }
  0x20   : > { %p1090_p12 = pnand %p1089_p11, %p1253_p5  ;;  %p1097_p2 = por %p1096_p1, %p1095_p0 }
  0x21   : > { %976 = vmatpush3.bf16.msra.mxu0 %v1081_v4 }
  0x22   : > { %977 = vmatprep.subr.bf16.mxu0 %v1082_v6  ;;  %1017 = vmatpush3.bf16.msra.mxu1 %v1084_v10  ;;  %p1091_p13 = pneg %p1090_p12 }
  0x23   : > { %1010 = vmatprep.subr.bf16.mxu1 %v1085_v13 }
  0x24   : > { %962 = vmatmul.mubr.msk.bf16.gmra.mrb[4].mxu0 %vm292_vm0, %v1075_v11  ;;  %p1098_p3 = pnand %p1097_p2, %p1091_p13 }
  0x25   : > { %965 = vmatprep.mubr.msk.bf16.mxu0 %vm292_vm0, %v1076_v12  ;;  %978 = vmatpush3.bf16.msra.mxu0 %v1082_v6 }
  0x26   : > { %979 = vmatprep.subr.bf16.mxu0 %v1083_v9  ;;  %1018 = vmatpush3.bf16.msra.mxu1 %v1085_v13 }
  0x27   : > { %1011 = vmatprep.subr.bf16.mxu1 %v1086_v14 }
  0x29   : > { %980 = vmatpush3.bf16.msra.mxu0 %v1083_v9 }
  0x2a   : > { %981 = vmatprep.subr.bf16.mxu0 %v1084_v10  ;;  %1019 = vmatpush3.bf16.msra.mxu1 %v1086_v14 }
  0x2b   : > { %1012 = vmatprep.subr.bf16.mxu1 %v1087_v18 }
  0x2c   : > { %966 = vmatmul.mubr.msk.bf16.gmra.mrb[8].mxu0 %vm292_vm0, %v1077_v15 }
  0x2d   : > { %969 = vmatprep.mubr.msk.bf16.mxu0 %vm292_vm0, %v1078_v16  ;;  %982 = vmatpush3.bf16.msra.mxu0 %v1084_v10 }
  0x2e   : > { %983 = vmatprep.subr.bf16.mxu0 %v1085_v13  ;;  %1020 = vmatpush3.bf16.msra.mxu1 %v1087_v18 }
  0x31   : > { %984 = vmatpush3.bf16.msra.mxu0 %v1085_v13 }
  0x32   : > { %985 = vmatprep.subr.bf16.mxu0 %v1086_v14 }
  0x34   : > { %970 = vmatmul.mubr.msk.bf16.gmra.mrb[12].mxu0 %vm292_vm0, %v1079_v17 }
  0x35   : > { %986 = vmatpush3.bf16.msra.mxu0 %v1086_v14 }
  0x36   : > { %987 = vmatprep.subr.bf16.mxu0 %v1087_v18 }
  0x39   : > { %988 = vmatpush3.bf16.msra.mxu0 %v1087_v18 }
  0xef   : > { %v959_v19 = vpop.f32.mrb[0].mxu0 }
  0xf0   : > { %v351_v20 = vpop.f32.mrb[1].mxu0 }
  0xf1   : > { %v960_v21 = vpop.f32.mrb[2].mxu0 }
  0xf2   : > { %v415_v22 = vpack.c.bf16 %v960_v21, %v959_v19  ;;  %v354_v23 = vpop.f32.mrb[3].mxu0 }
  0xf3   : > { %v414_v24 = vpack.c.bf16 %v354_v23, %v351_v20 }
  0xf4   : > { %917 = vst [vmem:[%s1322_s13 + $0x8] sm:$0xff] %v415_v22  }
  0xf5   : > { %881 = vst [vmem:[%s1322_s13] sm:$0xff] %v414_v24   ;;  %989 = vmatprep.mubr.bf16.mxu0 %v414_v24 }
  0xf6   : > { %990 = vmatmul.mubr.bf16.vlgmr.msra.gmra.mrb[16].mxu0 %v415_v22 }
  0xf7   : > { %v963_v25 = vpop.f32.mrb[4].mxu0 }
  0xf8   : > { %v367_v26 = vpop.f32.mrb[5].mxu0 }
  0xf9   : > { %v964_v27 = vpop.f32.mrb[6].mxu0 }
  0xfa   : > { %v417_v28 = vpack.c.bf16 %v964_v27, %v963_v25  ;;  %v370_v29 = vpop.f32.mrb[7].mxu0 }
  0xfb   : > { %v416_v30 = vpack.c.bf16 %v370_v29, %v367_v26 }
  0xfc   : > { %919 = vst [vmem:[%s1322_s13 + $0x18] sm:$0xff] %v417_v28  }
  0xfd   : > { %918 = vst [vmem:[%s1322_s13 + $0x10] sm:$0xff] %v416_v30   ;;  %993 = vmatprep.mubr.bf16.mxu1 %v416_v30 }
  0xfe   : > { %994 = vmatmul.mubr.bf16.vlgmr.msra.gmra.mrb[0].mxu1 %v417_v28 }
  0xff   : > { %v967_v31 = vpop.f32.mrb[8].mxu0 }
 0x100   : > { %v383_v32 = vpop.f32.mrb[9].mxu0 }
 0x101   : > { %v968_v33 = vpop.f32.mrb[10].mxu0 }
 0x102   : > { %v419_v34 = vpack.c.bf16 %v968_v33, %v967_v31  ;;  %v386_v35 = vpop.f32.mrb[11].mxu0 }
 0x103   : > { %v418_v36 = vpack.c.bf16 %v386_v35, %v383_v32 }
 0x104   : > { %921 = vst [vmem:[%s1322_s13 + $0x28] sm:$0xff] %v419_v34  }
 0x105   : > { %920 = vst [vmem:[%s1322_s13 + $0x20] sm:$0xff] %v418_v36   ;;  %997 = vmatprep.mubr.bf16.mxu1 %v418_v36 }
 0x106   : > { %998 = vmatmul.mubr.bf16.gmra.mrb[4].mxu1 %v419_v34 }
 0x107   : > { %v971_v37 = vpop.f32.mrb[12].mxu0 }
 0x108   : > { %v399_v38 = vpop.f32.mrb[13].mxu0 }
 0x109   : > { %v972_v39 = vpop.f32.mrb[14].mxu0 }
 0x10a   : > { %v421_v40 = vpack.c.bf16 %v972_v39, %v971_v37  ;;  %v402_v41 = vpop.f32.mrb[15].mxu0 }
 0x10b   : > { %v420_v42 = vpack.c.bf16 %v402_v41, %v399_v38 }
 0x10c   : > { %923 = vst [vmem:[%s1322_s13 + $0x38] sm:$0xff] %v421_v40  }
 0x10d   : > { %922 = vst [vmem:[%s1322_s13 + $0x30] sm:$0xff] %v420_v42   ;;  %1001 = vmatprep.mubr.bf16.mxu1 %v420_v42 }
 0x10e   : > { %1002 = vmatmul.mubr.bf16.gmra.mrb[8].mxu1 %v421_v40 }
 0x10f   : > { %1101 = shalt.err (!%p1098_p3)
}
 0x110   : > { %s1102_s7 = scalar_lea.hbm %s1337_s27, 1024  ;;  %s1106_s10 = scalar_lea.hbm %s1437_s3, 3072 }
 0x111   : > { %p1103_p4 = scmp.ne.s32.totalorder %s1337_s27, %s1102_s7  ;;  %p1107_p9 = scmp.lt.u32.totalorder %s1337_s27, %s1437_s3 }
 0x112   : > { %p1108_p10 = scmp.lt.u32.totalorder %s1106_s10, %s1102_s7  ;;  %p1110_p12 = scmp.lt.u32.totalorder %s1102_s7, %s1337_s27 }
 0x113   : > { %p1104_p7 = pnand %p1103_p4, %p1253_p5 }
 0x114   : > { %p1109_p11 = por %p1108_p10, %p1107_p9 }
 0x115   : > { %p1105_p8 = pneg %p1104_p7 }
 0x116   : > { %p1111_p13 = por %p1110_p12, %p1109_p11 }
 0x118   : > { %p1112_p0 = pnand %p1111_p13, %p1105_p8 }
 0x11a   : > { %1115 = shalt.err (!%p1112_p0)
}
 0x11b   : > { %s1185_s14 = smov 64   ;;  %s1186_s22 = smov 4  }
 0x11c   : > { %1021 = dma.vmem_to_hbm [thread:$0]  (%p1253_p5), %s1339_s20, 1024, %s1337_s27, %s672_s28, %s1185_s14, %s1185_s14, %s1186_s22  }
 0x11d   : > { %s805_s23 = sshll.u32 %s1319_s11, 7  ;;  %s876_s20 = sshll.u32 %s1236_s19, 11 }
 0x11e   : > { %s1366_s29 = scalar_lea.vmem [#allocation4], %s805_s23  ;;  %s1386_s5 = scalar_lea.hbm %s1438_s4, %s876_s20 }
 0x11f   : > { %s706_s27 = sshll.u32 %s1366_s29, 4  ;;  %s677_s19 = scalar_lea.sflag [#allocation5], %s1319_s11  ;;  %s1388_s27 = int_to_ptr.vmem [resolvable:$true] %s706_s27 }
 0x120   : > { %s1116_s6 = scalar_lea.vmem %s1388_s27, 2048  ;;  %s1187_s7 = smov [#allocation4]  }
 0x121   : > { %p1117_p1 = scmp.ne.s32.totalorder %s1388_s27, %s1116_s6  ;;  %s1120_s8 = sshll.u32 %s1187_s7, 4  ;;  %s1121_s8 = int_to_ptr.vmem [resolvable:$false] %s1120_s8 }
 0x122   : > { %s1122_s9 = scalar_lea.vmem %s1121_s8, 4096  ;;  %p1123_p4 = scmp.lt.s32.totalorder %s1388_s27, %s1121_s8 }
 0x123   : > { %p1118_p2 = pnand %p1117_p1, %p1253_p5  ;;  %p1124_p7 = scmp.lt.s32.totalorder %s1122_s9, %s1116_s6 }
 0x125   : > { %p1119_p3 = pneg %p1118_p2  ;;  %p1125_p8 = por %p1124_p7, %p1123_p4 }
 0x127   : > { %p1126_p9 = pnand %p1125_p8, %p1119_p3 }
 0x1c9   : > { %v991_v43 = vpop.f32.mrb[16].mxu0 }
 0x1ca   : > { %657 = vst [vmem:[%s1366_s29 + $0x10] sm:$0xff] %v991_v43  ;;  %v592_v44 = vpop.f32.mrb[17].mxu0 }
 0x1cb   : > { %655 = vst [vmem:[%s1366_s29] sm:$0xff] %v592_v44  ;;  %v992_v45 = vpop.f32.mrb[18].mxu0 }
 0x1cc   : > { %658 = vst [vmem:[%s1366_s29 + $0x18] sm:$0xff] %v992_v45  ;;  %v595_v46 = vpop.f32.mrb[19].mxu0 }
 0x1cd   : > { %656 = vst [vmem:[%s1366_s29 + $0x8] sm:$0xff] %v595_v46 }
 0x1d1   : > { %v995_v47 = vpop.f32.mrb[0].mxu1 }
 0x1d2   : > { %661 = vst [vmem:[%s1366_s29 + $0x30] sm:$0xff] %v995_v47  ;;  %v608_v48 = vpop.f32.mrb[1].mxu1 }
 0x1d3   : > { %659 = vst [vmem:[%s1366_s29 + $0x20] sm:$0xff] %v608_v48  ;;  %v996_v49 = vpop.f32.mrb[2].mxu1 }
 0x1d4   : > { %662 = vst [vmem:[%s1366_s29 + $0x38] sm:$0xff] %v996_v49  ;;  %v611_v50 = vpop.f32.mrb[3].mxu1 }
 0x1d5   : > { %660 = vst [vmem:[%s1366_s29 + $0x28] sm:$0xff] %v611_v50 }
 0x1d9   : > { %v999_v51 = vpop.f32.mrb[4].mxu1 }
 0x1da   : > { %665 = vst [vmem:[%s1366_s29 + $0x50] sm:$0xff] %v999_v51  ;;  %v624_v52 = vpop.f32.mrb[5].mxu1 }
 0x1db   : > { %663 = vst [vmem:[%s1366_s29 + $0x40] sm:$0xff] %v624_v52  ;;  %v1000_v53 = vpop.f32.mrb[6].mxu1 }
 0x1dc   : > { %666 = vst [vmem:[%s1366_s29 + $0x58] sm:$0xff] %v1000_v53  ;;  %v627_v54 = vpop.f32.mrb[7].mxu1 }
 0x1dd   : > { %664 = vst [vmem:[%s1366_s29 + $0x48] sm:$0xff] %v627_v54 }
 0x1e1   : > { %v1003_v55 = vpop.f32.mrb[8].mxu1 }
 0x1e2   : > { %669 = vst [vmem:[%s1366_s29 + $0x70] sm:$0xff] %v1003_v55  ;;  %v640_v56 = vpop.f32.mrb[9].mxu1 }
 0x1e3   : > { %667 = vst [vmem:[%s1366_s29 + $0x60] sm:$0xff] %v640_v56  ;;  %v1004_v57 = vpop.f32.mrb[10].mxu1 }
 0x1e4   : > { %670 = vst [vmem:[%s1366_s29 + $0x78] sm:$0xff] %v1004_v57  ;;  %v643_v58 = vpop.f32.mrb[11].mxu1 }
 0x1e5   : > { %668 = vst [vmem:[%s1366_s29 + $0x68] sm:$0xff] %v643_v58 }
 0x1e6   : > { %1129 = shalt.err (!%p1126_p9)
}
 0x1e7   : > { %s1130_s10 = scalar_lea.hbm %s1386_s5, 2048  ;;  %s1134_s14 = scalar_lea.hbm %s1438_s4, 6144 }
 0x1e8   : > { %p1131_p10 = scmp.ne.s32.totalorder %s1386_s5, %s1130_s10  ;;  %p1135_p13 = scmp.lt.u32.totalorder %s1386_s5, %s1438_s4 }
 0x1e9   : > { %p1136_p0 = scmp.lt.u32.totalorder %s1134_s14, %s1130_s10  ;;  %p1138_p2 = scmp.lt.u32.totalorder %s1130_s10, %s1386_s5 }
 0x1ea   : > { %p1132_p11 = pnand %p1131_p10, %p1253_p5 }
 0x1eb   : > { %p1137_p1 = por %p1136_p0, %p1135_p13 }
 0x1ec   : > { %p1133_p12 = pneg %p1132_p11 }
 0x1ed   : > { %p1139_p3 = por %p1138_p2, %p1137_p1 }
 0x1ef   : > { %p1140_p4 = pnand %p1139_p3, %p1133_p12 }
 0x1f1   : > { %1143 = shalt.err (!%p1140_p4)
}
 0x1f2   : > { %s1188_s29 = smov 128   ;;  %s1189_s20 = smov 8  }
 0x1f3   : > { %1022 = dma.vmem_to_hbm [thread:$0]  (%p1253_p5), %s1388_s27, 2048, %s1386_s5, %s677_s19, %s1188_s29, %s1188_s29, %s1189_s20  }
 0x1f4 PF: > { %p1032_p7 = scmp.ge.s32.totalorder %s1182_s18, 2  ;;  %s721_s28 = sand.u32 1, %s1170_s15  }
 0x1f5   : > { %s722_s30 = scalar_lea.sflag [#allocation3], %s721_s28 }
 0x1f6   : > { %p1026_p8 = pnand %p1032_p7, %p1257_p6 }
 0x1f8   : > { %1161 = dma.done.wait (!%p1026_p8), %s722_s30, 1024  }
 0x1f9   : > { %1163 = vsyncadd (!%p1026_p8), %s722_s30, 4294966272  ;;  %s731_s6 = scalar_lea.sflag [#allocation5], %s721_s28 }
 0x1fa   : > { %1165 = dma.done.wait (!%p1026_p8), %s731_s6, 2048  }
 0x1fb   : > { %1167 = vsyncadd (!%p1026_p8), %s731_s6, 4294965248  ;;  %p18_p5 = scmp.ge.s32.totalorder %s1240_s21, 5   ;;  %s1441_s15 = smov %s1174_s16 }
 0x1fc   : > { %s1442_s16 = smov %s1178_s17  ;;  %s1443_s17 = smov %s1251_s24 }
 0x1fd   : > { %s1444_s18 = smov %s1240_s21  ;;  %20 = sbr.rel (!%p18_p5) target bundleno = 5 (0x5), region = 84 }
 0x204   :  { %736 = vsyncpa [#allocation3], 1 }
 0x205   :  { %738 = vsyncpa [#allocation3 + $0x1], 1 }
 0x206   :  { %739 = vsyncpa [#allocation5], 1 }
 0x207   :  { %741 = vsyncpa [#allocation5 + $0x1], 1 }

</bundles_post_ra>
